<compile_context>
chip_gen: v7x
topology: tpu7x:2x2x1
jax: 0.10.0
libtpu: 0.0.40
codegen_flags: <defaults>
</compile_context>

<pallas_src>
import functools

import jax
import jax.numpy as jnp
import numpy as np
from jax import lax
from jax.experimental import pallas as pl
from jax.experimental.pallas import tpu as pltpu


def _cdiv(a, b):
    return -(-a // b)


def _round_up(a, b):
    return _cdiv(a, b) * b


def _split_dot(x_f32, s_bf16):
    """Segment sum x @ S with a 2-pass hi/lo bf16 split of the LHS.

    S is exactly 0/1 (bf16-exact), so
        x @ S == hi(x) @ S + lo(x) @ S    (up to the ~2^-16 LHS split residual)
    and each dot is a single native bf16 MXU pass with f32 accumulation,
    instead of 6 bf16 passes for an f32 precision=HIGHEST dot.
    """
    x_hi = x_f32.astype(jnp.bfloat16)
    x_lo = (x_f32 - x_hi.astype(jnp.float32)).astype(jnp.bfloat16)
    hi = jnp.dot(x_hi, s_bf16, preferred_element_type=jnp.float32)
    lo = jnp.dot(x_lo, s_bf16, preferred_element_type=jnp.float32)
    return hi + lo


def _second_moment_kernel(s_ref, pred_ref, gt_ref, out_ref, *,
                          seg_width, n_seg, tile_rows, blocks_per_core,
                          n_valid_rows):
    """Process one (tile_rows, n_seg*seg_width) block of lane-packed rows.

    Each packed row holds `n_seg` independent logical rows of length
    `seg_width` laid out contiguously along the lane axis.  Per-segment
    variance is computed one-pass (E[x^2] - E[x]^2) from segment sums obtained
    either via bf16 hi/lo-split MXU dots against the resident 0/1 matrix S
    (n_seg > 1) or plain VPU/XLU row reductions (n_seg == 1).
    """
    c = pl.program_id(0)          # core-split axis ("parallel", 2-way on v7x)
    i = pl.program_id(1)          # row-block axis ("arbitrary", reduction)

    @pl.when(i == 0)
    def _init():
        out_ref[...] = jnp.zeros_like(out_ref)

    p = pred_ref[...].astype(jnp.float32)          # (T, W)
    g = gt_ref[...].astype(jnp.float32)
    inv_d = 1.0 / float(seg_width)

    if n_seg == 1:
        # Wide-row path (last dim >= 128): skip the MXU; VPU adds + one XLU
        # lane-reduce per statistic.
        p_s1 = jnp.sum(p, axis=-1, keepdims=True)
        p_s2 = jnp.sum(p * p, axis=-1, keepdims=True)
        g_s1 = jnp.sum(g, axis=-1, keepdims=True)
        g_s2 = jnp.sum(g * g, axis=-1, keepdims=True)
    else:
        # Loop-invariant 0/1 block-diagonal segment-sum matrix: DMA'd into VMEM
        # once (constant index_map), never rebuilt per grid step.
        S = s_ref[...]                              # (W, n_seg) bf16
        p_s1 = _split_dot(p, S)
        p_s2 = _split_dot(p * p, S)
        g_s1 = _split_dot(g, S)
        g_s2 = _split_dot(g * g, S)

    # One-pass biased variance.  NOTE: E[x^2] - E[x]^2 loses accuracy when
    # |mean| >> std; if exactness there ever matters, switch to a mean-subtract
    # + second dot of (x - mean)^2 against S.
    p_var = p_s2 * inv_d - (p_s1 * inv_d) ** 2      # (T, n_seg)
    g_var = g_s2 * inv_d - (g_s1 * inv_d) ** 2
    diff = jnp.abs(p_var - g_var)                   # (T, n_seg)

    # Mask packed rows past the true end of the (un-padded) input.  This MUST
    # stay a select applied AFTER `diff`: padded/partial-block rows may hold
    # garbage (even Inf/NaN), and a select does not propagate values from the
    # unselected branch.  Do not convert it to a multiplication.
    block_idx = c * blocks_per_core + i
    row0 = block_idx * tile_rows
    local = lax.broadcasted_iota(jnp.int32, diff.shape, 0)
    diff = jnp.where(row0 + local < n_valid_rows, diff, 0.0)

    # Scalar partial for this step, broadcast-added onto the whole (8,128)
    # resident block so the eventual HBM writeback stays lane-dense / unmasked.
    out_ref[...] += jnp.sum(diff)


def second_moment_loss(pred, gt, *, per_buffer_bytes=2 * 1024 * 1024):
    """Pallas implementation of second_moment_loss.forward(pred, gt)."""
    assert pred.shape == gt.shape, "pred and gt must share a shape"
    D = int(pred.shape[-1])
    R = int(np.prod(pred.shape[:-1])) if pred.ndim > 1 else 1

    # ---- lane packing ------------------------------------------------------
    # Put G logical rows side by side on the lane axis (metadata-only reshape).
    # G = largest divisor of R with G*D <= 128, so awkward row counts still
    # keep lane density high instead of collapsing to G = 1.
    G = 1
    if D < 128:
        gmax = max(1, min(128 // D, R))
        for cand in range(gmax, 0, -1):
            if R % cand == 0:
                G = cand
                break
    Rp = R // G                    # packed rows
    W = G * D                      # packed lane width (== full last dim)

    p2 = pred.reshape(Rp, W)       # native dtype: cast to f32 only inside VMEM
    g2 = gt.reshape(Rp, W)

    # Block-diagonal 0/1 segment-sum matrix (exactly representable in bf16).
    s_np = (np.arange(W)[:, None] // D == np.arange(G)[None, :]).astype(np.float32)
    S = jnp.asarray(s_np, dtype=jnp.bfloat16)

    # ---- per-generation knobs ---------------------------------------------
    kind = ""
    try:
        kind = jax.devices()[0].device_kind.lower()
    except Exception:
        kind = ""
    is_v7 = "7" in kind
    is_big_vmem = (("v5" in kind) or ("v6" in kind)) and not is_v7   # 128 MiB VMEM parts
    if is_big_vmem:
        row_budget_bytes = 2 * per_buffer_bytes     # v5e/v6e: bigger DMA tiles
        vmem_cap = 96 << 20
    else:
        row_budget_bytes = per_buffer_bytes         # v7x / unknown: 64 MiB VMEM per TC
        vmem_cap = 48 << 20

    # ---- tile sizing from an intermediate-aware VMEM budget -----------------
    itemsize = int(np.dtype(pred.dtype).itemsize)
    lane_pad = _round_up(W, 128)                    # VMEM lanes pad to 128
    sub_mult = 8 * max(1, 4 // itemsize)            # 8 f32 / 16 bf16 / 32 fp8 rows
    if Rp <= sub_mult:
        tile_rows = Rp                              # single full-extent block
    else:
        # Budget rows by the f32 footprint: the in-kernel f32 temporaries (not
        # the native-dtype DMA buffers) dominate VMEM for bf16/fp8 inputs.
        t = row_budget_bytes // (lane_pad * 4)
        t = max(sub_mult, (t // sub_mult) * sub_mult)
        tile_rows = int(min(t, _round_up(Rp, sub_mult)))

    nb = _cdiv(Rp, tile_rows)                       # total row blocks

    # ---- core split: multi-TC parts only, and only when blocks split evenly
    # (avoids re-DMAing a fully-masked duplicate tail tile).
    num_core_splits = 2 if is_v7 else 1
    if num_core_splits > 1 and nb >= num_core_splits and nb % num_core_splits:
        # Shrink the tile slightly so nb becomes a multiple of the core count.
        tr = max(sub_mult,
                 _round_up(_cdiv(Rp, _round_up(nb, num_core_splits)), sub_mult))
        if _cdiv(Rp, tr) % num_core_splits == 0:
            tile_rows, nb = tr, _cdiv(Rp, tr)
    if nb < num_core_splits or nb % num_core_splits:
        num_core_splits = 1
    bpc = nb // num_core_splits                     # row blocks per core split
    grid = (num_core_splits, bpc)

    def in_map(c, i):
        return (c * bpc + i, 0)

    # 2 native-dtype inputs x 2 pipeline buffers, plus a generous bound on the
    # f32/bf16 temporaries the kernel materializes, plus headroom.
    in_bytes = 2 * 2 * tile_rows * lane_pad * itemsize
    tmp_bytes = 8 * tile_rows * lane_pad * 4
    vmem_needed = in_bytes + tmp_bytes + (4 << 20)
    vmem_limit = int(min(max(vmem_needed, 32 << 20), vmem_cap))

    out = pl.pallas_call(
        functools.partial(
            _second_moment_kernel,
            seg_width=D, n_seg=G, tile_rows=tile_rows,
            blocks_per_core=bpc, n_valid_rows=Rp),
        out_shape=jax.ShapeDtypeStruct((num_core_splits * 8, 128), jnp.float32),
        grid_spec=pltpu.PrefetchScalarGridSpec(
            num_scalar_prefetch=0,
            grid=grid,
            in_specs=[
                pl.BlockSpec((W, G), lambda c, i: (0, 0)),   # S: constant, resident
                pl.BlockSpec((tile_rows, W), in_map),
                pl.BlockSpec((tile_rows, W), in_map),
            ],
            out_specs=pl.BlockSpec((8, 128), lambda c, i: (c, 0)),
        ),
        compiler_params=pltpu.CompilerParams(
            dimension_semantics=("parallel", "arbitrary"),
            vmem_limit_bytes=vmem_limit,
        ),
    )(S, p2, g2)

    # Every element of each per-core (8,128) block holds that core's partial sum.
    partials = out[::8, 0]                          # (num_core_splits,)
    return jnp.sum(partials) / float(R)


def _reference(pred, gt):
    p = pred.astype(jnp.float32)
    g = gt.astype(jnp.float32)
    pv = jnp.mean((p - jnp.mean(p, axis=-1, keepdims=True)) ** 2, axis=-1)
    gv = jnp.mean((g - jnp.mean(g, axis=-1, keepdims=True)) ** 2, axis=-1)
    return jnp.mean(jnp.abs(pv - gv))


if __name__ == "__main__":
    key = jax.random.PRNGKey(0)
    k1, k2 = jax.random.split(key)
    # Small shapes consistent with the module: arbitrary leading dims, reduce over last dim.
    pred = jax.random.normal(k1, (2, 4, 16, 16), dtype=jnp.float32)
    gt = jax.random.normal(k2, (2, 4, 16, 16), dtype=jnp.float32)

    loss = second_moment_loss(pred, gt)
    loss = jax.block_until_ready(loss)

    ref = jax.block_until_ready(_reference(pred, gt))
    # Tolerance accounts for the 2-term hi/lo bf16 LHS split (~2^-16 relative
    # per element) used for the MXU segment sums; real bugs are orders larger.
    np.testing.assert_allclose(np.asarray(loss), np.asarray(ref), rtol=2e-5, atol=5e-6)

    print("KERNEL_OK")
</pallas_src>

<mosaic_0001>
module attributes {stable_mosaic.version = 11 : i64} {
  func.func @_second_moment_kernel(%arg0: i32, %arg1: i32, %arg2: memref<128x8xbf16, #tpu.memory_space<vmem>>, %arg3: memref<16x128xf32, #tpu.memory_space<vmem>>, %arg4: memref<16x128xf32, #tpu.memory_space<vmem>>, %arg5: memref<8x128xf32, #tpu.memory_space<vmem>>) attributes {dimension_semantics = [#tpu.dimension_semantics<parallel>, #tpu.dimension_semantics<arbitrary>], iteration_bounds = array<i64: 1, 1>, scalar_prefetch = 0 : i64, scratch_operands = 0 : i64, tpu.core_type = #tpu.core_type<tc>, window_params = [{pipeline_mode = #tpu.pipeline_mode<synchronous>, transform_indices = @transform_0, window_bounds = array<i64: 128, 8>}, {transform_indices = @transform_1, window_bounds = array<i64: 16, 128>}, {transform_indices = @transform_2, window_bounds = array<i64: 16, 128>}, {transform_indices = @transform_3, window_bounds = array<i64: 8, 128>}]} {
    %c0_i32 = arith.constant 0 : i32
    %0 = arith.cmpi eq, %arg1, %c0_i32 : i32
    %1 = arith.extui %0 : i1 to i32
    %c0_i32_0 = arith.constant 0 : i32
    %2 = arith.cmpi ne, %1, %c0_i32_0 : i32
    scf.if %2 {
      %cst_24 = arith.constant 0.000000e+00 : f32
      %68 = vector.broadcast %cst_24 : f32 to vector<8x128xf32>
      %c0_25 = arith.constant 0 : index
      %c0_26 = arith.constant 0 : index
      %69 = vector.load %arg5[%c0_25, %c0_26] : memref<8x128xf32, #tpu.memory_space<vmem>>, vector<8x128xf32>
      tpu.vector_store %arg5[%c0_25, %c0_26], %68 {strides = array<i32>} : memref<8x128xf32, #tpu.memory_space<vmem>>, vector<8x128xf32>,
    } else {
    }
    %c0 = arith.constant 0 : index
    %c0_1 = arith.constant 0 : index
    %3 = vector.load %arg3[%c0, %c0_1] : memref<16x128xf32, #tpu.memory_space<vmem>>, vector<16x128xf32>
    %c0_2 = arith.constant 0 : index
    %c0_3 = arith.constant 0 : index
    %4 = vector.load %arg4[%c0_2, %c0_3] : memref<16x128xf32, #tpu.memory_space<vmem>>, vector<16x128xf32>
    %c0_4 = arith.constant 0 : index
    %c0_5 = arith.constant 0 : index
    %5 = vector.load %arg2[%c0_4, %c0_5] : memref<128x8xbf16, #tpu.memory_space<vmem>>, vector<128x8xbf16>
    %6 = arith.truncf %3 : vector<16x128xf32> to vector<16x128xbf16>
    %7 = arith.extf %6 : vector<16x128xbf16> to vector<16x128xf32>
    %8 = arith.subf %3, %7 : vector<16x128xf32>
    %9 = arith.truncf %8 : vector<16x128xf32> to vector<16x128xbf16>
    %cst = arith.constant dense<0.000000e+00> : vector<16x8xf32>
    %10 = tpu.matmul %6, %5, %cst {dimension_numbers = #tpu.dot_dimension_numbers<[1], [0], [0], [1], [0, 0, 1, 1], [], []>} : vector<16x128xbf16>, vector<128x8xbf16>, vector<16x8xf32> -> vector<16x8xf32>
    %cst_6 = arith.constant dense<0.000000e+00> : vector<16x8xf32>
    %11 = tpu.matmul %9, %5, %cst_6 {dimension_numbers = #tpu.dot_dimension_numbers<[1], [0], [0], [1], [0, 0, 1, 1], [], []>} : vector<16x128xbf16>, vector<128x8xbf16>, vector<16x8xf32> -> vector<16x8xf32>
    %12 = arith.addf %10, %11 : vector<16x8xf32>
    %13 = arith.mulf %3, %3 : vector<16x128xf32>
    %14 = arith.truncf %13 : vector<16x128xf32> to vector<16x128xbf16>
    %15 = arith.extf %14 : vector<16x128xbf16> to vector<16x128xf32>
    %16 = arith.subf %13, %15 : vector<16x128xf32>
    %17 = arith.truncf %16 : vector<16x128xf32> to vector<16x128xbf16>
    %cst_7 = arith.constant dense<0.000000e+00> : vector<16x8xf32>
    %18 = tpu.matmul %14, %5, %cst_7 {dimension_numbers = #tpu.dot_dimension_numbers<[1], [0], [0], [1], [0, 0, 1, 1], [], []>} : vector<16x128xbf16>, vector<128x8xbf16>, vector<16x8xf32> -> vector<16x8xf32>
    %cst_8 = arith.constant dense<0.000000e+00> : vector<16x8xf32>
    %19 = tpu.matmul %17, %5, %cst_8 {dimension_numbers = #tpu.dot_dimension_numbers<[1], [0], [0], [1], [0, 0, 1, 1], [], []>} : vector<16x128xbf16>, vector<128x8xbf16>, vector<16x8xf32> -> vector<16x8xf32>
    %20 = arith.addf %18, %19 : vector<16x8xf32>
    %21 = arith.truncf %4 : vector<16x128xf32> to vector<16x128xbf16>
    %22 = arith.extf %21 : vector<16x128xbf16> to vector<16x128xf32>
    %23 = arith.subf %4, %22 : vector<16x128xf32>
    %24 = arith.truncf %23 : vector<16x128xf32> to vector<16x128xbf16>
    %cst_9 = arith.constant dense<0.000000e+00> : vector<16x8xf32>
    %25 = tpu.matmul %21, %5, %cst_9 {dimension_numbers = #tpu.dot_dimension_numbers<[1], [0], [0], [1], [0, 0, 1, 1], [], []>} : vector<16x128xbf16>, vector<128x8xbf16>, vector<16x8xf32> -> vector<16x8xf32>
    %cst_10 = arith.constant dense<0.000000e+00> : vector<16x8xf32>
    %26 = tpu.matmul %24, %5, %cst_10 {dimension_numbers = #tpu.dot_dimension_numbers<[1], [0], [0], [1], [0, 0, 1, 1], [], []>} : vector<16x128xbf16>, vector<128x8xbf16>, vector<16x8xf32> -> vector<16x8xf32>
    %27 = arith.addf %25, %26 : vector<16x8xf32>
    %28 = arith.mulf %4, %4 : vector<16x128xf32>
    %29 = arith.truncf %28 : vector<16x128xf32> to vector<16x128xbf16>
    %30 = arith.extf %29 : vector<16x128xbf16> to vector<16x128xf32>
    %31 = arith.subf %28, %30 : vector<16x128xf32>
    %32 = arith.truncf %31 : vector<16x128xf32> to vector<16x128xbf16>
    %cst_11 = arith.constant dense<0.000000e+00> : vector<16x8xf32>
    %33 = tpu.matmul %29, %5, %cst_11 {dimension_numbers = #tpu.dot_dimension_numbers<[1], [0], [0], [1], [0, 0, 1, 1], [], []>} : vector<16x128xbf16>, vector<128x8xbf16>, vector<16x8xf32> -> vector<16x8xf32>
    %cst_12 = arith.constant dense<0.000000e+00> : vector<16x8xf32>
    %34 = tpu.matmul %32, %5, %cst_12 {dimension_numbers = #tpu.dot_dimension_numbers<[1], [0], [0], [1], [0, 0, 1, 1], [], []>} : vector<16x128xbf16>, vector<128x8xbf16>, vector<16x8xf32> -> vector<16x8xf32>
    %35 = arith.addf %33, %34 : vector<16x8xf32>
    %cst_13 = arith.constant 6.250000e-02 : f32
    %36 = vector.broadcast %cst_13 : f32 to vector<16x8xf32>
    %37 = arith.mulf %20, %36 : vector<16x8xf32>
    %cst_14 = arith.constant 6.250000e-02 : f32
    %38 = vector.broadcast %cst_14 : f32 to vector<16x8xf32>
    %39 = arith.mulf %12, %38 : vector<16x8xf32>
    %40 = arith.mulf %39, %39 : vector<16x8xf32>
    %41 = arith.subf %37, %40 : vector<16x8xf32>
    %cst_15 = arith.constant 6.250000e-02 : f32
    %42 = vector.broadcast %cst_15 : f32 to vector<16x8xf32>
    %43 = arith.mulf %35, %42 : vector<16x8xf32>
    %cst_16 = arith.constant 6.250000e-02 : f32
    %44 = vector.broadcast %cst_16 : f32 to vector<16x8xf32>
    %45 = arith.mulf %27, %44 : vector<16x8xf32>
    %46 = arith.mulf %45, %45 : vector<16x8xf32>
    %47 = arith.subf %43, %46 : vector<16x8xf32>
    %48 = arith.subf %41, %47 : vector<16x8xf32>
    %49 = math.absf %48 : vector<16x8xf32>
    %c1_i32 = arith.constant 1 : i32
    %50 = arith.muli %arg0, %c1_i32 : i32
    %51 = arith.addi %50, %arg1 : i32
    %c16_i32 = arith.constant 16 : i32
    %52 = arith.muli %51, %c16_i32 : i32
    %53 = tpu.iota {dimensions = array<i32: 0>} : vector<16x8xi32>
    %54 = vector.broadcast %52 : i32 to vector<16x8xi32>
    %55 = arith.addi %54, %53 : vector<16x8xi32>
    %c16_i32_17 = arith.constant 16 : i32
    %56 = vector.broadcast %c16_i32_17 : i32 to vector<16x8xi32>
    %57 = arith.cmpi slt, %55, %56 : vector<16x8xi32>
    %cst_18 = arith.constant 0.000000e+00 : f32
    %58 = vector.broadcast %cst_18 : f32 to vector<16x8xf32>
    %59 = arith.select %57, %49, %58 : vector<16x8xi1>, vector<16x8xf32>
    %c0_19 = arith.constant 0 : index
    %c0_20 = arith.constant 0 : index
    %60 = vector.load %arg5[%c0_19, %c0_20] : memref<8x128xf32, #tpu.memory_space<vmem>>, vector<8x128xf32>
    %61 = vector.shape_cast %59 : vector<16x8xf32> to vector<1x16x8xf32>
    %cst_21 = arith.constant dense<0.000000e+00> : vector<1xf32>
    %62 = vector.multi_reduction <add>, %61, %cst_21 [1, 2] : vector<1x16x8xf32> to vector<1xf32>
    %63 = vector.shape_cast %62 : vector<1xf32> to vector<1x1x1xf32>
    %64 = vector.extract %63[0, 0, 0] : f32 from vector<1x1x1xf32>
    %65 = vector.broadcast %64 : f32 to vector<8x128xf32>
    %66 = arith.addf %60, %65 : vector<8x128xf32>
    %c0_22 = arith.constant 0 : index
    %c0_23 = arith.constant 0 : index
    %67 = vector.load %arg5[%c0_22, %c0_23] : memref<8x128xf32, #tpu.memory_space<vmem>>, vector<8x128xf32>
    tpu.vector_store %arg5[%c0_22, %c0_23], %66 {strides = array<i32>} : memref<8x128xf32, #tpu.memory_space<vmem>>, vector<8x128xf32>,
    return
  }
  func.func @transform_0(%arg0: i32, %arg1: i32) -> (i32, i32) {
    %c0_i32 = arith.constant 0 : i32
    %c0_i32_0 = arith.constant 0 : i32
    %c0_i32_1 = arith.constant 0 : i32
    return %c0_i32, %c0_i32_0 : i32, i32
  }
  func.func @transform_1(%arg0: i32, %arg1: i32) -> (i32, i32) {
    %c1_i32 = arith.constant 1 : i32
    %0 = arith.muli %arg0, %c1_i32 : i32
    %1 = arith.addi %0, %arg1 : i32
    %c0_i32 = arith.constant 0 : i32
    %c0_i32_0 = arith.constant 0 : i32
    return %1, %c0_i32 : i32, i32
  }
  func.func @transform_2(%arg0: i32, %arg1: i32) -> (i32, i32) {
    %c1_i32 = arith.constant 1 : i32
    %0 = arith.muli %arg0, %c1_i32 : i32
    %1 = arith.addi %0, %arg1 : i32
    %c0_i32 = arith.constant 0 : i32
    %c0_i32_0 = arith.constant 0 : i32
    return %1, %c0_i32 : i32, i32
  }
  func.func @transform_3(%arg0: i32, %arg1: i32) -> (i32, i32) {
    %c0_i32 = arith.constant 0 : i32
    %c0_i32_0 = arith.constant 0 : i32
    return %arg0, %c0_i32 : i32, i32
  }
}

</mosaic_0001>

<bundles_post_ra>
// kernel: tpu_custom_call.1
= control target key start
LH: loop header
LB: loop body
LE: loop exit
PB: predicated region body
PF: predicated region fallthrough
CT: control target
= control target key end

     0   :  { %v857_v1 = vmov 0.0   ;;  %vm858_vm0 = vmmov 0   ;;  %s1098_s0 = inlined_call_operand.vmem [shape: bf16[128,8], index: 0, kind: input, shape index: {}]   ;;  %s1099_s1 = inlined_call_operand.vmem [shape: f32[16,128], index: 1, kind: input, shape index: {}]   ;;  %s1100_s2 = inlined_call_operand.vmem [shape: f32[16,128], index: 2, kind: input, shape index: {}]   ;;  %s1101_s3 = inlined_call_operand.hbm [shape: f32[8,128], index: 3, kind: output, shape index: {}]  }
   0x1   :  { %v883_v0 = vld [vmem:[%s1098_s0] sm:$0xff]   ;;  %644 = vmatprep.subr.bf16.mxu0 %v857_v1  ;;  %684 = vmatprep.subr.bf16.mxu1 %v857_v1  ;;  %v892_v2 = vld [vmem:[%s1098_s0 + $0x8] sm:$0xff]   ;;  %v905_v3 = vld [vmem:[%s1098_s0 + $0x10] sm:$0xff]  }
   0x2   :  { %645 = vmatpush3.bf16.msra.mxu0 %v883_v0  ;;  %685 = vmatpush3.bf16.msra.mxu1 %v883_v0 }
   0x3   :  { %646 = vmatprep.subr.bf16.mxu0 %v857_v1  ;;  %686 = vmatprep.subr.bf16.mxu1 %v857_v1 }
   0x4   :  { %660 = vmatprep.mubr.msk.bf16.mxu0 %vm858_vm0, %v857_v1  ;;  %700 = vmatprep.mubr.msk.bf16.mxu1 %vm858_vm0, %v857_v1 }
   0x6   :  { %647 = vmatpush3.bf16.msra.mxu0 %v892_v2  ;;  %687 = vmatpush3.bf16.msra.mxu1 %v892_v2 }
   0x7   :  { %648 = vmatprep.subr.bf16.mxu0 %v857_v1  ;;  %688 = vmatprep.subr.bf16.mxu1 %v857_v1 }
   0x8   :  { %8 = vsyncpa [#allocation3], 0  ;;  %v914_v4 = vld [vmem:[%s1098_s0 + $0x18] sm:$0xff]   ;;  %v65_v5 = vld [vmem:[%s1099_s1] sm:$0xff]  ;;  %vm522_vm1 = vcmask 64512  }
   0x9   :  { %v66_v6 = vld [vmem:[%s1099_s1 + $0x8] sm:$0xff]  ;;  %v221_v7 = vmul.f32 %v65_v5, %v65_v5  ;;  %v929_v9 = vld [vmem:[%s1098_s0 + $0x20] sm:$0xff]   ;;  %v955_v17 = vld [vmem:[%s1098_s0 + $0x30] sm:$0xff]  }
   0xa   :  { %649 = vmatpush3.bf16.msra.mxu0 %v905_v3  ;;  %689 = vmatpush3.bf16.msra.mxu1 %v905_v3  ;;  %v222_v8 = vmul.f32 %v66_v6, %v66_v6  ;;  %v933_v10 = vpack.c.bf16 %v66_v6, %v65_v5  ;;  %v942_v12 = vld [vmem:[%s1098_s0 + $0x28] sm:$0xff]   ;;  %v964_v22 = vld [vmem:[%s1098_s0 + $0x38] sm:$0xff]   ;;  %v67_v25 = vld [vmem:[%s1100_s2] sm:$0xff] }
   0xb   :  { %650 = vmatprep.subr.bf16.mxu0 %v857_v1  ;;  %690 = vmatprep.subr.bf16.mxu1 %v857_v1  ;;  %v68_v26 = vld [vmem:[%s1100_s2 + $0x8] sm:$0xff]  ;;  %v399_v27 = vmul.f32 %v67_v25, %v67_v25  ;;  %s859_s2 = smov [#allocation2]  }
   0xc   :  { %v935_v11 = vpack.c.bf16 %v222_v8, %v221_v7  ;;  %v86_v13 = vunpack.c.l.bf16 %v933_v10  ;;  %v87_v14 = vunpack.c.h.bf16 %v933_v10  ;;  %v400_v28 = vmul.f32 %v68_v26, %v68_v26  ;;  %s544_s7 = sshll.u32 %s859_s2, 4  ;;  %s545_s7 = int_to_ptr.vmem [resolvable:$true] %s544_s7 }
   0xd   :  { %v311_v29 = vpack.c.bf16 %v68_v26, %v67_v25  ;;  %s833_s9 = scalar_lea.vmem %s545_s7, 128  ;;  %p838_p1 = scmp.lt.s32.totalorder %s545_s7, %s545_s7 }
   0xe   :  { %651 = vmatpush3.bf16.msra.mxu0 %v914_v4  ;;  %691 = vmatpush3.bf16.msra.mxu1 %v914_v4  ;;  %v224_v15 = vunpack.c.l.bf16 %v935_v11  ;;  %v225_v16 = vunpack.c.h.bf16 %v935_v11  ;;  %v88_v18 = vsub.f32 %v65_v5, %v86_v13  ;;  %v89_v19 = vsub.f32 %v66_v6, %v87_v14  ;;  %p834_p0 = scmp.ne.s32.totalorder %s545_s7, %s833_s9  ;;  %p839_p2 = scmp.lt.s32.totalorder %s833_s9, %s833_s9 }
   0xf   :  { %652 = vmatprep.subr.bf16.mxu0 %v857_v1  ;;  %692 = vmatprep.subr.bf16.mxu1 %v857_v1  ;;  %v401_v30 = vpack.c.bf16 %v400_v28, %v399_v27  ;;  %v312_v31 = vunpack.c.l.bf16 %v311_v29  ;;  %v313_v32 = vunpack.c.h.bf16 %v311_v29 }
  0x10   :  { %v226_v20 = vsub.f32 %v221_v7, %v224_v15  ;;  %v227_v21 = vsub.f32 %v222_v8, %v225_v16  ;;  %v90_v23 = vpack.c.bf16 %v89_v19, %v88_v18  ;;  %p840_p3 = por %p839_p2, %p838_p1 }
  0x11   :  { %v402_v33 = vunpack.c.l.bf16 %v401_v30  ;;  %v403_v34 = vunpack.c.h.bf16 %v401_v30  ;;  %v314_v35 = vsub.f32 %v67_v25, %v312_v31  ;;  %v315_v36 = vsub.f32 %v68_v26, %v313_v32 }
  0x12   :  { %653 = vmatpush3.bf16.msra.mxu0 %v929_v9  ;;  %693 = vmatpush3.bf16.msra.mxu1 %v929_v9  ;;  %v228_v24 = vpack.c.bf16 %v227_v21, %v226_v20  ;;  %p841_p4 = pnand %p840_p3, %p834_p0 }
  0x13   :  { %654 = vmatprep.subr.bf16.mxu0 %v857_v1  ;;  %694 = vmatprep.subr.bf16.mxu1 %v857_v1  ;;  %v404_v37 = vsub.f32 %v399_v27, %v402_v33  ;;  %v405_v38 = vsub.f32 %v400_v28, %v403_v34  ;;  %v316_v39 = vpack.c.bf16 %v315_v36, %v314_v35 }
  0x15   :  { %v406_v40 = vpack.c.bf16 %v405_v38, %v404_v37 }
  0x16   :  { %655 = vmatpush3.bf16.msra.mxu0 %v942_v12  ;;  %695 = vmatpush3.bf16.msra.mxu1 %v942_v12 }
  0x17   :  { %656 = vmatprep.subr.bf16.mxu0 %v857_v1  ;;  %696 = vmatprep.subr.bf16.mxu1 %v857_v1 }
  0x1a   :  { %657 = vmatpush3.bf16.msra.mxu0 %v955_v17  ;;  %697 = vmatpush3.bf16.msra.mxu1 %v955_v17 }
  0x1b   :  { %658 = vmatprep.subr.bf16.mxu0 %v857_v1  ;;  %698 = vmatprep.subr.bf16.mxu1 %v857_v1 }
  0x1e   :  { %659 = vmatpush3.bf16.msra.mxu0 %v964_v22  ;;  %699 = vmatpush3.bf16.msra.mxu1 %v964_v22 }
  0x1f   :  { %664 = vmatprep.subr.bf16.mxu0 %v857_v1  ;;  %704 = vmatprep.subr.bf16.mxu1 %v857_v1 }
  0x21   :  { %661 = vmatmul.mubr.bf16.vlgmr.msra.gmra.mrb[0].mxu0 %v90_v23  ;;  %701 = vmatmul.mubr.bf16.vlgmr.msra.gmra.mrb[0].mxu1 %v228_v24 }
  0x22   :  { %665 = vmatpush3.bf16.msra.mxu0 %v883_v0  ;;  %705 = vmatpush3.bf16.msra.mxu1 %v883_v0 }
  0x23   :  { %666 = vmatprep.subr.bf16.mxu0 %v857_v1  ;;  %706 = vmatprep.subr.bf16.mxu1 %v857_v1 }
  0x24   :  { %680 = vmatprep.mubr.msk.bf16.mxu0 %vm858_vm0, %v857_v1  ;;  %720 = vmatprep.mubr.msk.bf16.mxu1 %vm858_vm0, %v857_v1 }
  0x26   :  { %667 = vmatpush3.bf16.msra.mxu0 %v892_v2  ;;  %707 = vmatpush3.bf16.msra.mxu1 %v892_v2 }
  0x27   :  { %668 = vmatprep.subr.bf16.mxu0 %v857_v1  ;;  %708 = vmatprep.subr.bf16.mxu1 %v857_v1 }
  0x2a   :  { %669 = vmatpush3.bf16.msra.mxu0 %v905_v3  ;;  %709 = vmatpush3.bf16.msra.mxu1 %v905_v3 }
  0x2b   :  { %670 = vmatprep.subr.bf16.mxu0 %v857_v1  ;;  %710 = vmatprep.subr.bf16.mxu1 %v857_v1 }
  0x2e   :  { %671 = vmatpush3.bf16.msra.mxu0 %v914_v4  ;;  %711 = vmatpush3.bf16.msra.mxu1 %v914_v4 }
  0x2f   :  { %672 = vmatprep.subr.bf16.mxu0 %v857_v1  ;;  %712 = vmatprep.subr.bf16.mxu1 %v857_v1 }
  0x32   :  { %673 = vmatpush3.bf16.msra.mxu0 %v929_v9  ;;  %713 = vmatpush3.bf16.msra.mxu1 %v929_v9 }
  0x33   :  { %674 = vmatprep.subr.bf16.mxu0 %v857_v1  ;;  %714 = vmatprep.subr.bf16.mxu1 %v857_v1 }
  0x36   :  { %675 = vmatpush3.bf16.msra.mxu0 %v942_v12  ;;  %715 = vmatpush3.bf16.msra.mxu1 %v942_v12 }
  0x37   :  { %676 = vmatprep.subr.bf16.mxu0 %v857_v1  ;;  %716 = vmatprep.subr.bf16.mxu1 %v857_v1 }
  0x3a   :  { %677 = vmatpush3.bf16.msra.mxu0 %v955_v17  ;;  %717 = vmatpush3.bf16.msra.mxu1 %v955_v17 }
  0x3b   :  { %678 = vmatprep.subr.bf16.mxu0 %v857_v1  ;;  %718 = vmatprep.subr.bf16.mxu1 %v857_v1 }
  0x3e   :  { %679 = vmatpush3.bf16.msra.mxu0 %v964_v22  ;;  %719 = vmatpush3.bf16.msra.mxu1 %v964_v22 }
  0x3f   :  { %724 = vmatprep.subr.bf16.mxu0 %v857_v1  ;;  %764 = vmatprep.subr.bf16.mxu1 %v857_v1 }
  0x41   :  { %681 = vmatmul.mubr.bf16.vlgmr.msra.gmra.mrb[0].mxu0 %v933_v10  ;;  %721 = vmatmul.mubr.bf16.vlgmr.msra.gmra.mrb[0].mxu1 %v935_v11 }
  0x42   :  { %725 = vmatpush3.bf16.msra.mxu0 %v883_v0  ;;  %765 = vmatpush3.bf16.msra.mxu1 %v883_v0 }
  0x43   :  { %726 = vmatprep.subr.bf16.mxu0 %v857_v1  ;;  %766 = vmatprep.subr.bf16.mxu1 %v857_v1 }
  0x44   :  { %740 = vmatprep.mubr.msk.bf16.mxu0 %vm858_vm0, %v857_v1  ;;  %780 = vmatprep.mubr.msk.bf16.mxu1 %vm858_vm0, %v857_v1 }
  0x46   :  { %727 = vmatpush3.bf16.msra.mxu0 %v892_v2  ;;  %767 = vmatpush3.bf16.msra.mxu1 %v892_v2 }
  0x47   :  { %728 = vmatprep.subr.bf16.mxu0 %v857_v1  ;;  %768 = vmatprep.subr.bf16.mxu1 %v857_v1 }
  0x4a   :  { %729 = vmatpush3.bf16.msra.mxu0 %v905_v3  ;;  %769 = vmatpush3.bf16.msra.mxu1 %v905_v3 }
  0x4b   :  { %730 = vmatprep.subr.bf16.mxu0 %v857_v1  ;;  %770 = vmatprep.subr.bf16.mxu1 %v857_v1 }
  0x4e   :  { %731 = vmatpush3.bf16.msra.mxu0 %v914_v4  ;;  %771 = vmatpush3.bf16.msra.mxu1 %v914_v4 }
  0x4f   :  { %732 = vmatprep.subr.bf16.mxu0 %v857_v1  ;;  %772 = vmatprep.subr.bf16.mxu1 %v857_v1 }
  0x52   :  { %733 = vmatpush3.bf16.msra.mxu0 %v929_v9  ;;  %773 = vmatpush3.bf16.msra.mxu1 %v929_v9 }
  0x53   :  { %734 = vmatprep.subr.bf16.mxu0 %v857_v1  ;;  %774 = vmatprep.subr.bf16.mxu1 %v857_v1 }
  0x56   :  { %735 = vmatpush3.bf16.msra.mxu0 %v942_v12  ;;  %775 = vmatpush3.bf16.msra.mxu1 %v942_v12 }
  0x57   :  { %736 = vmatprep.subr.bf16.mxu0 %v857_v1  ;;  %776 = vmatprep.subr.bf16.mxu1 %v857_v1 }
  0x5a   :  { %737 = vmatpush3.bf16.msra.mxu0 %v955_v17  ;;  %777 = vmatpush3.bf16.msra.mxu1 %v955_v17 }
  0x5b   :  { %738 = vmatprep.subr.bf16.mxu0 %v857_v1  ;;  %778 = vmatprep.subr.bf16.mxu1 %v857_v1 }
  0x5e   :  { %739 = vmatpush3.bf16.msra.mxu0 %v964_v22  ;;  %779 = vmatpush3.bf16.msra.mxu1 %v964_v22 }
  0x5f   :  { %744 = vmatprep.subr.bf16.mxu0 %v857_v1  ;;  %784 = vmatprep.subr.bf16.mxu1 %v857_v1 }
  0x61   :  { %741 = vmatmul.mubr.bf16.vlgmr.msra.gmra.mrb[4].mxu0 %v316_v39  ;;  %781 = vmatmul.mubr.bf16.vlgmr.msra.gmra.mrb[4].mxu1 %v406_v40 }
  0x62   :  { %745 = vmatpush3.bf16.msra.mxu0 %v883_v0  ;;  %785 = vmatpush3.bf16.msra.mxu1 %v883_v0 }
  0x63   :  { %746 = vmatprep.subr.bf16.mxu0 %v857_v1  ;;  %786 = vmatprep.subr.bf16.mxu1 %v857_v1 }
  0x64   :  { %760 = vmatprep.mubr.msk.bf16.mxu0 %vm858_vm0, %v857_v1  ;;  %800 = vmatprep.mubr.msk.bf16.mxu1 %vm858_vm0, %v857_v1 }
  0x66   :  { %747 = vmatpush3.bf16.msra.mxu0 %v892_v2  ;;  %787 = vmatpush3.bf16.msra.mxu1 %v892_v2 }
  0x67   :  { %748 = vmatprep.subr.bf16.mxu0 %v857_v1  ;;  %788 = vmatprep.subr.bf16.mxu1 %v857_v1 }
  0x6a   :  { %749 = vmatpush3.bf16.msra.mxu0 %v905_v3  ;;  %789 = vmatpush3.bf16.msra.mxu1 %v905_v3 }
  0x6b   :  { %750 = vmatprep.subr.bf16.mxu0 %v857_v1  ;;  %790 = vmatprep.subr.bf16.mxu1 %v857_v1 }
  0x6e   :  { %751 = vmatpush3.bf16.msra.mxu0 %v914_v4  ;;  %791 = vmatpush3.bf16.msra.mxu1 %v914_v4 }
  0x6f   :  { %752 = vmatprep.subr.bf16.mxu0 %v857_v1  ;;  %792 = vmatprep.subr.bf16.mxu1 %v857_v1 }
  0x72   :  { %753 = vmatpush3.bf16.msra.mxu0 %v929_v9  ;;  %793 = vmatpush3.bf16.msra.mxu1 %v929_v9 }
  0x73   :  { %754 = vmatprep.subr.bf16.mxu0 %v857_v1  ;;  %794 = vmatprep.subr.bf16.mxu1 %v857_v1 }
  0x76   :  { %755 = vmatpush3.bf16.msra.mxu0 %v942_v12  ;;  %795 = vmatpush3.bf16.msra.mxu1 %v942_v12 }
  0x77   :  { %756 = vmatprep.subr.bf16.mxu0 %v857_v1  ;;  %796 = vmatprep.subr.bf16.mxu1 %v857_v1 }
  0x7a   :  { %757 = vmatpush3.bf16.msra.mxu0 %v955_v17  ;;  %797 = vmatpush3.bf16.msra.mxu1 %v955_v17 }
  0x7b   :  { %758 = vmatprep.subr.bf16.mxu0 %v857_v1  ;;  %798 = vmatprep.subr.bf16.mxu1 %v857_v1 }
  0x7e   :  { %759 = vmatpush3.bf16.msra.mxu0 %v964_v22  ;;  %799 = vmatpush3.bf16.msra.mxu1 %v964_v22 }
  0x81   :  { %761 = vmatmul.mubr.bf16.vlgmr.msra.gmra.mrb[4].mxu0 %v311_v29  ;;  %801 = vmatmul.mubr.bf16.vlgmr.msra.gmra.mrb[4].mxu1 %v401_v30 }
 0x114   :  { %v214_v41 = vpop.f32.mrb[0].mxu0  ;;  %v304_v42 = vpop.f32.mrb[0].mxu1 }
 0x115   :  { %v491_v43 = vmul.f32 0.0625, %v214_v41  ;;  %v682_v44 = vpop.f32.mrb[1].mxu0  ;;  %v722_v45 = vpop.f32.mrb[1].mxu1  ;;  %v489_v49 = vmul.f32 0.0625, %v304_v42 }
 0x116   :  { %v217_v46 = vpop.f32.mrb[2].mxu0  ;;  %v307_v47 = vpop.f32.mrb[2].mxu1 }
 0x117   :  { %v493_v48 = vmul.f32 %v491_v43, %v491_v43  ;;  %v492_v50 = vmul.f32 0.0625, %v217_v46  ;;  %v683_v51 = vpop.f32.mrb[3].mxu0  ;;  %v723_v52 = vpop.f32.mrb[3].mxu1  ;;  %v490_v55 = vmul.f32 0.0625, %v307_v47 }
 0x119   :  { %v495_v53 = vsub.f32 %v489_v49, %v493_v48  ;;  %v494_v54 = vmul.f32 %v492_v50, %v492_v50 }
 0x11b   :  { %v496_v56 = vsub.f32 %v490_v55, %v494_v54 }
 0x154   :  { %v392_v57 = vpop.f32.mrb[4].mxu0  ;;  %v482_v58 = vpop.f32.mrb[4].mxu1 }
 0x155   :  { %v499_v59 = vmul.f32 0.0625, %v392_v57  ;;  %v762_v60 = vpop.f32.mrb[5].mxu0  ;;  %v802_v61 = vpop.f32.mrb[5].mxu1  ;;  %v497_v1 = vmul.f32 0.0625, %v482_v58 }
 0x156   :  { %v395_v62 = vpop.f32.mrb[6].mxu0  ;;  %v485_v63 = vpop.f32.mrb[6].mxu1 }
 0x157   :  { %v501_v0 = vmul.f32 %v499_v59, %v499_v59  ;;  %v500_v2 = vmul.f32 0.0625, %v395_v62  ;;  %v763_v3 = vpop.f32.mrb[7].mxu0  ;;  %v803_v4 = vpop.f32.mrb[7].mxu1  ;;  %v498_v7 = vmul.f32 0.0625, %v485_v63 }
 0x159   :  { %v503_v5 = vsub.f32 %v497_v1, %v501_v0  ;;  %v502_v6 = vmul.f32 %v500_v2, %v500_v2 }
 0x15b   :  { %v504_v8 = vsub.f32 %v498_v7, %v502_v6  ;;  %v505_v9 = vsub.f32 %v495_v53, %v503_v5 }
 0x15d   :  { %v506_v10 = vsub.f32 %v496_v56, %v504_v8  ;;  %v507_v11 = vand.u32 2147483647, %v505_v9 }
 0x15f   :  { %v508_v12 = vand.u32 2147483647, %v506_v10  ;;  %v523_v13 = vsel %vm522_vm1, %v507_v11, 0.0 }
 0x161   :  { %v524_v14 = vsel %vm522_vm1, %v508_v12, 0.0 }
 0x162   :  { %v525_v15 = vadd.f32 %v524_v14, %v523_v13 }
 0x164   :  { %526 = vadd.xlane.f32.xlu0 %v525_v15 }
 0x1f1   :  { %v527_v16 = vpop.xlane.xlu0 %526 }
 0x1f2   :  { %v528_v17 = vrot.slane %v527_v16, 4 }
 0x1f4   :  { %v529_v18 = vadd.f32 %v528_v17, %v527_v16 }
 0x1f6   :  { %v530_v19 = vrot.slane %v529_v18, 2 }
 0x1f8   :  { %v531_v20 = vadd.f32 %v530_v19, %v529_v18 }
 0x1fa   :  { %v532_v21 = vrot.slane %v531_v20, 1 }
 0x1fc   :  { %v533_v22 = vadd.f32 %v532_v21, %v531_v20 }
 0x1fe   :  { %820 = vpush %v533_v22 }
 0x22f   :  { %s821_s8 = spop %820 }
 0x230   :  { %v535_v23 = vstv %s821_s8 }
 0x231   :  { %537 = vst [vmem:[#allocation2] sm:$0xff] %v535_v23 }
 0x232   :  { %844 = shalt.err (!%p841_p4)
}
 0x233   :  { %s845_s12 = scalar_lea.hbm %s1101_s3, 128 }
 0x234   :  { %p846_p5 = scmp.ne.s32.totalorder %s1101_s3, %s845_s12  ;;  %p849_p6 = scmp.lt.u32.totalorder %s845_s12, %s1101_s3 }
 0x236   :  { %p851_p7 = pnand %p849_p6, %p846_p5 }
 0x238   :  { %854 = shalt.err (!%p851_p7)
}
 0x239   :  { %547 = dma.vmem_to_hbm [thread:$0]  %s545_s7, 128, %s1101_s3, [#allocation3]  }
 0x23a   :  { %855 = dma.done.wait [#allocation3], 128  }
 0x23b   :  { %856 = vsyncadd [#allocation3], 4294967168 }
 0x23c   :  { %551 = vsyncpa [#allocation3], 1 }

</bundles_post_ra>
